<compile_context>
chip_gen: v7x
topology: tpu7x:2x2x1
jax: 0.10.0
libtpu: 0.0.40
codegen_flags: <defaults>
</compile_context>

<pallas_src>
import functools

import jax
import jax.numpy as jnp
from jax import lax
from jax.experimental import pallas as pl
from jax.experimental.pallas import tpu as pltpu

LANES = 128
SUBLANES = 8
TM_MAX = 1024          # rows per grid step; 2 inputs * 2 bufs * 512 KiB ~= 2 MiB VMEM
NUM_CORES = 2          # leading parallel axis (exploited by v7x's 2 TensorCores)


def _bce_kernel(x_ref, t_ref, out_ref, acc_ref, *, tm, tpc, n_elems, ragged):
    """Accumulate sum(bce) over the inner (reduction) axis; one partial per core."""
    j = pl.program_id(1)

    @pl.when(j == 0)
    def _init():
        acc_ref[...] = jnp.zeros_like(acc_ref)

    x = x_ref[...].astype(jnp.float32)
    t = t_ref[...].astype(jnp.float32)

    # Numerically stable BCE with logits (matches nn.BCEWithLogitsLoss).
    # exp + log1p land on the EUP (free slot while HBM-bound on v6e/v7x).
    bce = jnp.maximum(x, 0.0) - x * t + jnp.log1p(jnp.exp(-jnp.abs(x)))

    if ragged:
        # Mask everything past the true tensor end: padded tail elements,
        # rows of an overhanging edge tile, and the (clamped) duplicate tile
        # a core may revisit when tiles don't split evenly across cores.
        # int32 flat index is fine below ~2^31 elements.
        c = pl.program_id(0)
        blk = c * tpc + j                       # logical (unclamped) tile index
        base = blk * (tm * LANES)
        row = lax.broadcasted_iota(jnp.int32, (tm, LANES), 0)
        col = lax.broadcasted_iota(jnp.int32, (tm, LANES), 1)
        gidx = base + row * LANES + col
        bce = jnp.where(gidx < n_elems, bce, 0.0)

    acc_ref[...] += bce                          # pure VPU add per step

    @pl.when(j == pl.num_programs(1) - 1)
    def _finalize():
        out_ref[...] = jnp.reshape(jnp.sum(acc_ref[...]), (1, 1, 1))


def bce_with_logits_loss_weighted(x, target):
    """Pallas implementation of BCEWithLogitsLossWeighted(weighted=False).forward."""
    assert x.shape == target.shape
    n_elems = int(x.size)

    x_flat = jnp.ravel(x)
    t_flat = jnp.ravel(target)

    # Pad (only when necessary) to whole (8, 128) rows so the slab reshape is
    # metadata-only in the common case. Padded elements are masked in-kernel.
    chunk = SUBLANES * LANES
    padded = pl.cdiv(n_elems, chunk) * chunk
    if padded != n_elems:
        x_flat = jnp.pad(x_flat, (0, padded - n_elems))
        t_flat = jnp.pad(t_flat, (0, padded - n_elems))
    m_rows = padded // LANES                     # multiple of 8

    x2 = x_flat.reshape(m_rows, LANES)
    t2 = t_flat.reshape(m_rows, LANES)

    tm = min(TM_MAX, m_rows)                     # multiple of 8 by construction
    num_tiles = pl.cdiv(m_rows, tm)
    nc = NUM_CORES if num_tiles >= 2 * NUM_CORES else 1
    tpc = pl.cdiv(num_tiles, nc)                 # tiles per core

    # Any element a visited tile touches that lies past the true end?
    ragged = (padded != n_elems) or (num_tiles * tm != m_rows) or (nc * tpc != num_tiles)
    clamp = nc * tpc != num_tiles
    last_block = num_tiles - 1

    def in_map(c, j):
        blk = c * tpc + j
        if clamp:
            # Keep the DMA in bounds; the in-kernel mask zeroes the duplicate tile.
            blk = jnp.minimum(blk, last_block)
        return (blk, 0)

    tile_spec = pl.BlockSpec((tm, LANES), in_map)
    kernel = functools.partial(
        _bce_kernel, tm=tm, tpc=tpc, n_elems=n_elems, ragged=ragged)

    partials = pl.pallas_call(
        kernel,
        out_shape=jax.ShapeDtypeStruct((nc, 1, 1), jnp.float32),
        grid_spec=pltpu.PrefetchScalarGridSpec(
            num_scalar_prefetch=0,
            grid=(nc, tpc),
            in_specs=[tile_spec, tile_spec],
            out_specs=pl.BlockSpec((1, 1, 1), lambda c, j: (c, 0, 0)),
            scratch_shapes=[pltpu.VMEM((tm, LANES), jnp.float32)],
        ),
        compiler_params=pltpu.CompilerParams(
            dimension_semantics=("parallel", "arbitrary"),
        ),
    )(x2, t2)

    # weighted=False, to_ignore=None  =>  sum(weight_mask) == numel (static).
    return jnp.sum(partials) / n_elems


def _reference(x, target):
    xf = x.astype(jnp.float32)
    tf = target.astype(jnp.float32)
    bce = jnp.maximum(xf, 0.0) - xf * tf + jnp.log1p(jnp.exp(-jnp.abs(xf)))
    return jnp.sum(bce) / xf.size


if __name__ == "__main__":
    key = jax.random.PRNGKey(0)
    kx, kt = jax.random.split(key)

    # Small shape consistent with the module: foreground logits [N, C, H, W].
    shape = (2, 4, 16, 16)
    x = jax.random.normal(kx, shape, dtype=jnp.float32) * 2.0
    target = jax.random.uniform(kt, shape, dtype=jnp.float32)  # values in [0, 1]

    loss = jax.block_until_ready(bce_with_logits_loss_weighted(x, target))
    ref = _reference(x, target)
    assert jnp.allclose(loss, ref, rtol=1e-5, atol=1e-5), (loss, ref)

    # Second check exercising the multi-tile / multi-core / ragged-tail paths.
    shape2 = (2, 3, 300, 300)
    x2 = jax.random.normal(kx, shape2, dtype=jnp.float32) * 3.0
    t2 = jax.random.uniform(kt, shape2, dtype=jnp.float32)
    loss2 = jax.block_until_ready(bce_with_logits_loss_weighted(x2, t2))
    ref2 = _reference(x2, t2)
    assert jnp.allclose(loss2, ref2, rtol=2e-4, atol=2e-4), (loss2, ref2)

    print("KERNEL_OK")
</pallas_src>

<mosaic_0001>
module attributes {stable_mosaic.version = 11 : i64} {
  func.func @_bce_kernel(%arg0: i32, %arg1: i32, %arg2: memref<16x128xf32, #tpu.memory_space<vmem>>, %arg3: memref<16x128xf32, #tpu.memory_space<vmem>>, %arg4: memref<1x1x1xf32, #tpu.memory_space<vmem>>, %arg5: memref<16x128xf32, #tpu.memory_space<vmem>>) attributes {dimension_semantics = [#tpu.dimension_semantics<parallel>, #tpu.dimension_semantics<arbitrary>], iteration_bounds = array<i64: 1, 1>, scalar_prefetch = 0 : i64, scratch_operands = 1 : i64, tpu.core_type = #tpu.core_type<tc>, window_params = [{transform_indices = @transform_0, window_bounds = array<i64: 16, 128>}, {transform_indices = @transform_1, window_bounds = array<i64: 16, 128>}, {transform_indices = @transform_2, window_bounds = array<i64: 1, 1, 1>}]} {
    %c0_i32 = arith.constant 0 : i32
    %0 = arith.cmpi eq, %arg1, %c0_i32 : i32
    %1 = arith.extui %0 : i1 to i32
    %c0_i32_0 = arith.constant 0 : i32
    %2 = arith.cmpi ne, %1, %c0_i32_0 : i32
    scf.if %2 {
      %cst_11 = arith.constant 0.000000e+00 : f32
      %21 = vector.broadcast %cst_11 : f32 to vector<16x128xf32>
      %c0_12 = arith.constant 0 : index
      %c0_13 = arith.constant 0 : index
      %22 = vector.load %arg5[%c0_12, %c0_13] : memref<16x128xf32, #tpu.memory_space<vmem>>, vector<16x128xf32>
      tpu.vector_store %arg5[%c0_12, %c0_13], %21 {strides = array<i32>} : memref<16x128xf32, #tpu.memory_space<vmem>>, vector<16x128xf32>,
    } else {
    }
    %c0 = arith.constant 0 : index
    %c0_1 = arith.constant 0 : index
    %3 = vector.load %arg2[%c0, %c0_1] : memref<16x128xf32, #tpu.memory_space<vmem>>, vector<16x128xf32>
    %c0_2 = arith.constant 0 : index
    %c0_3 = arith.constant 0 : index
    %4 = vector.load %arg3[%c0_2, %c0_3] : memref<16x128xf32, #tpu.memory_space<vmem>>, vector<16x128xf32>
    %cst = arith.constant 0.000000e+00 : f32
    %5 = vector.broadcast %cst : f32 to vector<16x128xf32>
    %6 = arith.maximumf %3, %5 : vector<16x128xf32>
    %7 = arith.mulf %3, %4 : vector<16x128xf32>
    %8 = arith.subf %6, %7 : vector<16x128xf32>
    %9 = math.absf %3 : vector<16x128xf32>
    %cst_4 = arith.constant 0.000000e+00 : f32
    %10 = vector.broadcast %cst_4 : f32 to vector<16x128xf32>
    %11 = arith.subf %10, %9 : vector<16x128xf32>
    %12 = math.exp %11 : vector<16x128xf32>
    %13 = math.log1p %12 : vector<16x128xf32>
    %14 = arith.addf %8, %13 : vector<16x128xf32>
    %c0_5 = arith.constant 0 : index
    %c0_6 = arith.constant 0 : index
    %15 = vector.load %arg5[%c0_5, %c0_6] : memref<16x128xf32, #tpu.memory_space<vmem>>, vector<16x128xf32>
    %16 = arith.addf %15, %14 : vector<16x128xf32>
    %c0_7 = arith.constant 0 : index
    %c0_8 = arith.constant 0 : index
    %17 = vector.load %arg5[%c0_7, %c0_8] : memref<16x128xf32, #tpu.memory_space<vmem>>, vector<16x128xf32>
    tpu.vector_store %arg5[%c0_7, %c0_8], %16 {strides = array<i32>} : memref<16x128xf32, #tpu.memory_space<vmem>>, vector<16x128xf32>,
    %c0_i32_9 = arith.constant 0 : i32
    %18 = arith.cmpi eq, %arg1, %c0_i32_9 : i32
    %19 = arith.extui %18 : i1 to i32
    %c0_i32_10 = arith.constant 0 : i32
    %20 = arith.cmpi ne, %19, %c0_i32_10 : i32
    scf.if %20 {
      %c0_11 = arith.constant 0 : index
      %c0_12 = arith.constant 0 : index
      %21 = vector.load %arg5[%c0_11, %c0_12] : memref<16x128xf32, #tpu.memory_space<vmem>>, vector<16x128xf32>
      %22 = vector.shape_cast %21 : vector<16x128xf32> to vector<1x16x128xf32>
      %cst_13 = arith.constant dense<0.000000e+00> : vector<1xf32>
      %23 = vector.multi_reduction <add>, %22, %cst_13 [1, 2] : vector<1x16x128xf32> to vector<1xf32>
      %24 = vector.shape_cast %23 : vector<1xf32> to vector<1x1x1xf32>
      %25 = vector.extract %24[0, 0, 0] : f32 from vector<1x1x1xf32>
      %26 = vector.broadcast %25 : f32 to vector<1x1x1xf32>
      %c0_14 = arith.constant 0 : index
      %c0_15 = arith.constant 0 : index
      %c0_16 = arith.constant 0 : index
      %27 = vector.load %arg4[%c0_14, %c0_15, %c0_16] : memref<1x1x1xf32, #tpu.memory_space<vmem>>, vector<1x1x1xf32>
      tpu.vector_store %arg4[%c0_14, %c0_15, %c0_16], %26 {strides = array<i32>} : memref<1x1x1xf32, #tpu.memory_space<vmem>>, vector<1x1x1xf32>,
    } else {
    }
    return
  }
  func.func @transform_0(%arg0: i32, %arg1: i32) -> (i32, i32) {
    %c1_i32 = arith.constant 1 : i32
    %0 = arith.muli %arg0, %c1_i32 : i32
    %1 = arith.addi %0, %arg1 : i32
    %c0_i32 = arith.constant 0 : i32
    %c0_i32_0 = arith.constant 0 : i32
    return %1, %c0_i32 : i32, i32
  }
  func.func @transform_1(%arg0: i32, %arg1: i32) -> (i32, i32) {
    %c1_i32 = arith.constant 1 : i32
    %0 = arith.muli %arg0, %c1_i32 : i32
    %1 = arith.addi %0, %arg1 : i32
    %c0_i32 = arith.constant 0 : i32
    %c0_i32_0 = arith.constant 0 : i32
    return %1, %c0_i32 : i32, i32
  }
  func.func @transform_2(%arg0: i32, %arg1: i32) -> (i32, i32, i32) {
    %c0_i32 = arith.constant 0 : i32
    %c0_i32_0 = arith.constant 0 : i32
    %c0_i32_1 = arith.constant 0 : i32
    return %arg0, %c0_i32, %c0_i32_0 : i32, i32, i32
  }
}

</mosaic_0001>

<bundles_post_ra>
// kernel: tpu_custom_call.1
= control target key start
LH: loop header
LB: loop body
LE: loop exit
PB: predicated region body
PF: predicated region fallthrough
CT: control target
= control target key end

     0   :  { %7 = vsyncpa [#allocation4], 0  ;;  %s279_s0 = inlined_call_operand.hbm [shape: f32[16,128], index: 0, kind: input, shape index: {}]   ;;  %s280_s1 = inlined_call_operand.hbm [shape: f32[16,128], index: 1, kind: input, shape index: {}]   ;;  %s281_s2 = inlined_call_operand.hbm [shape: f32[1,1,1], index: 2, kind: output, shape index: {}]  }
   0x1   :  { %8 = vsyncpa [#allocation7], 0 }
   0x2   :  { %9 = vsyncpa [#allocation5], 0  ;;  %s223_s9 = smov [#allocation3]   ;;  %s151_s13 = scalar_lea.hbm %s279_s0, 256 }
   0x3   :  { %s19_s10 = sshll.u32 %s223_s9, 4  ;;  %p152_p0 = scmp.ne.s32.totalorder %s279_s0, %s151_s13  ;;  %s20_s10 = int_to_ptr.vmem [resolvable:$true] %s19_s10 }
   0x4   :  { %p155_p1 = scmp.lt.u32.totalorder %s151_s13, %s279_s0 }
   0x6   :  { %p157_p2 = pnand %p155_p1, %p152_p0 }
   0x8   :  { %160 = shalt.err (!%p157_p2)
}
   0x9   :  { %s161_s18 = scalar_lea.vmem %s20_s10, 256  ;;  %p166_p4 = scmp.lt.s32.totalorder %s20_s10, %s20_s10 }
   0xa   :  { %p162_p3 = scmp.ne.s32.totalorder %s20_s10, %s161_s18  ;;  %p167_p5 = scmp.lt.s32.totalorder %s161_s18, %s161_s18 }
   0xc   :  { %p168_p6 = por %p167_p5, %p166_p4 }
   0xe   :  { %p169_p7 = pnand %p168_p6, %p162_p3 }
  0x10   :  { %172 = shalt.err (!%p169_p7)
}
  0x11   :  { %s224_s19 = smov 128   ;;  %s225_s20 = smov 8  }
  0x12   :  { %25 = dma.hbm_to_vmem [thread:$0]  %s279_s0, 256, %s20_s10, [#allocation4], %s224_s19, %s224_s19, %s225_s20  }
  0x13   :  { %s226_s23 = smov [#allocation6]   ;;  %s173_s27 = scalar_lea.hbm %s280_s1, 256 }
  0x14   :  { %s35_s24 = sshll.u32 %s226_s23, 4  ;;  %p174_p8 = scmp.ne.s32.totalorder %s280_s1, %s173_s27  ;;  %s36_s24 = int_to_ptr.vmem [resolvable:$true] %s35_s24 }
  0x15   :  { %p177_p9 = scmp.lt.u32.totalorder %s173_s27, %s280_s1 }
  0x17   :  { %p179_p10 = pnand %p177_p9, %p174_p8 }
  0x19   :  { %182 = shalt.err (!%p179_p10)
}
  0x1a   :  { %s183_s4 = scalar_lea.vmem %s36_s24, 256  ;;  %p188_p12 = scmp.lt.s32.totalorder %s36_s24, %s36_s24 }
  0x1b   :  { %p184_p11 = scmp.ne.s32.totalorder %s36_s24, %s183_s4  ;;  %p189_p13 = scmp.lt.s32.totalorder %s183_s4, %s183_s4 }
  0x1d   :  { %p190_p0 = por %p189_p13, %p188_p12 }
  0x1f   :  { %p191_p1 = pnand %p190_p0, %p184_p11 }
  0x21   :  { %194 = shalt.err (!%p191_p1)
}
  0x22   :  { %41 = dma.hbm_to_vmem [thread:$0]  %s280_s1, 256, %s36_s24, [#allocation7], %s224_s19, %s224_s19, %s225_s20  }
  0x23   :  { %217 = dma.done.wait [#allocation4], 256  }
  0x24   :  { %218 = vsyncadd [#allocation4], 4294967040 }
  0x25   :  { %219 = dma.done.wait [#allocation7], 256  }
  0x26   :  { %220 = vsyncadd [#allocation7], 4294967040  ;;  %v58_v0 = vld [vmem:[#allocation3] sm:$0xff]  ;;  %v59_v1 = vld [vmem:[#allocation3 + $0x8] sm:$0xff]  ;;  %s227_s1 = smov [#allocation8]   ;;  %vm118_vm2 = vcmask 0  }
  0x27   :  { %v68_v2 = vand.u32 2147483647, %v58_v0  ;;  %v69_v3 = vand.u32 2147483647, %v59_v1  ;;  %v60_v14 = vld [vmem:[#allocation6] sm:$0xff]  ;;  %v61_v15 = vld [vmem:[#allocation6 + $0x8] sm:$0xff] }
  0x28   :  { %v62_v17 = vmax.f32 %v58_v0, 0.0  ;;  %v64_v18 = vmul.f32 %v60_v14, %v58_v0  ;;  %v63_v21 = vmax.f32 %v59_v1, 0.0  ;;  %v65_v22 = vmul.f32 %v61_v15, %v59_v1  ;;  %s126_s6 = sshll.u32 %s227_s1, 4  ;;  %s127_s6 = int_to_ptr.vmem [resolvable:$true] %s126_s6 }
  0x29   :  { %v70_v4 = vsub.f32 0.0, %v68_v2  ;;  %v71_v5 = vsub.f32 0.0, %v69_v3  ;;  %s195_s8 = scalar_lea.vmem %s127_s6, 16  ;;  %s199_s9 = scalar_lea.vmem %s127_s6, 32 }
  0x2a   :  { %v66_v26 = vsub.f32 %v62_v17, %v64_v18  ;;  %v67_v29 = vsub.f32 %v63_v21, %v65_v22  ;;  %p196_p2 = scmp.ne.s32.totalorder %s127_s6, %s195_s8  ;;  %p200_p3 = scmp.lt.s32.totalorder %s127_s6, %s127_s6 }
  0x2b   :  { %v72_v6 = vmul.f32 1.442695, %v70_v4  ;;  %v74_v7 = vmul.f32 1.442695, %v71_v5  ;;  %p201_p4 = scmp.lt.s32.totalorder %s199_s9, %s195_s8 }
  0x2d   :  { %143 = vpow2.f32 %v72_v6  ;;  %p202_p5 = por %p201_p4, %p200_p3 }
  0x2e   :  { %145 = vpow2.f32 %v74_v7 }
  0x2f   :  { %p203_p6 = pnand %p202_p5, %p196_p2 }
  0x37   :  { %v144_v8 = vpop.eup %143 }
  0x38   :  { %v146_v9 = vpop.eup %145  ;;  %v76_v10 = vadd.f32 1.0, %v144_v8  ;;  %v79_v12 = vmul.f32 -0.5, %v144_v8  ;;  %v82_v19 = vand.u32 2147483647, %v144_v8 }
  0x39   :  { %v85_v11 = vadd.f32 1.0, %v146_v9  ;;  %v88_v13 = vmul.f32 -0.5, %v146_v9  ;;  %v91_v23 = vand.u32 2147483647, %v146_v9 }
  0x3a   :  { %147 = vlog2.f32 %v76_v10  ;;  %v80_v16 = vadd.f32 1.0, %v79_v12  ;;  %vm83_vm0 = vcmp.lt.f32.partialorder %v82_v19, 0.0004427343 }
  0x3b   :  { %149 = vlog2.f32 %v85_v11  ;;  %v89_v20 = vadd.f32 1.0, %v88_v13  ;;  %vm92_vm1 = vcmp.lt.f32.partialorder %v91_v23, 0.0004427343 }
  0x3c   :  { %v81_v24 = vmul.f32 %v144_v8, %v80_v16 }
  0x3d   :  { %v90_v27 = vmul.f32 %v146_v9, %v89_v20 }
  0x44   :  { %v148_v25 = vpop.eup %147 }
  0x45   :  { %v150_v28 = vpop.eup %149  ;;  %v78_v30 = vmul.f32 0.6931472, %v148_v25 }
  0x46   :  { %v87_v31 = vmul.f32 0.6931472, %v150_v28 }
  0x47   :  { %v84_v32 = vsel %vm83_vm0, %v81_v24, %v78_v30 }
  0x48   :  { %v93_v33 = vsel %vm92_vm1, %v90_v27, %v87_v31  ;;  %v94_v34 = vadd.f32 %v84_v32, %v66_v26 }
  0x49   :  { %v95_v35 = vadd.f32 %v93_v33, %v67_v29 }
  0x4b   :  { %v107_v36 = vadd.f32 %v95_v35, %v94_v34 }
  0x4d   :  { %108 = vadd.xlane.f32.xlu0 %v107_v36 }
  0xda   :  { %v109_v37 = vpop.xlane.xlu0 %108 }
  0xdb   :  { %v110_v38 = vrot.slane %v109_v37, 4 }
  0xdd   :  { %v111_v39 = vadd.f32 %v110_v38, %v109_v37 }
  0xdf   :  { %v112_v40 = vrot.slane %v111_v39, 2 }
  0xe1   :  { %v113_v41 = vadd.f32 %v112_v40, %v111_v39 }
  0xe3   :  { %v114_v42 = vrot.slane %v113_v41, 1 }
  0xe5   :  { %v115_v43 = vadd.f32 %v114_v42, %v113_v41 }
  0xe7   :  { %136 = vpush %v115_v43 }
 0x118   :  { %s137_s7 = spop %136 }
 0x119   :  { %v117_v44 = vstv %s137_s7 }
 0x11a   :  { %119 = vst.msk [vmem:[#allocation8] sm:$0x1] %vm118_vm2, %v117_v44 }
 0x11b   :  { %206 = shalt.err (!%p203_p6)
}
 0x11c   :  { %s207_s12 = scalar_lea.hbm %s281_s2, 16 }
 0x11d   :  { %p208_p7 = scmp.ne.s32.totalorder %s281_s2, %s207_s12  ;;  %p211_p8 = scmp.lt.u32.totalorder %s207_s12, %s281_s2 }
 0x11f   :  { %p213_p9 = pnand %p211_p8, %p208_p7 }
 0x121   :  { %216 = shalt.err (!%p213_p9)
}
 0x122   :  { %129 = dma.vmem_to_hbm [thread:$0]  %s127_s6, 16, %s281_s2, [#allocation5]  }
 0x123   :  { %221 = dma.done.wait [#allocation5], 16  }
 0x124   :  { %222 = vsyncadd [#allocation5], 4294967280 }
 0x125   :  { %133 = vsyncpa [#allocation4], 1 }
 0x126   :  { %134 = vsyncpa [#allocation7], 1 }
 0x127   :  { %135 = vsyncpa [#allocation5], 1 }

</bundles_post_ra>
